<compile_context>
chip_gen: v5e
topology: v5e:2x2
jax: 0.10.0
libtpu: 0.0.40
codegen_flags: <defaults>
</compile_context>

<pallas_src>
import functools

import jax
import jax.numpy as jnp
from jax.experimental import pallas as pl
from jax.experimental.pallas import tpu as pltpu


_FUSED_TILE_BYTES = 4 << 20     # per-batch (C, HW) slab budget for fused path
_TARGET_BLOCK_BYTES = 4 << 20   # per (1, C, hw_tile) tile in fallback path
_VMEM_LIMIT_BYTES = 32 << 20    # safe on v5e/v6e (128 MiB) and v7x (64 MiB)


# --------------------------------------------------------------------------
# Fused single-pass kernel: pool + gate MLP + scale, one grid step per batch.
# --------------------------------------------------------------------------
def _fused_se_kernel(x_ref, w1_ref, b1_ref, w2_ref, b2_ref, o_ref, *, inv_hw):
    x = x_ref[...]                                                 # (1, C, HW)
    # Spatial mean over the lane axis (XLU reduce), f32 accumulation.
    pooled = jnp.sum(x.astype(jnp.float32), axis=-1) * inv_hw      # (1, C)
    # Excitation MLP: Linear -> ReLU -> Linear -> Sigmoid (tiny, MXU + EUP).
    h = jnp.dot(pooled, w1_ref[...], preferred_element_type=jnp.float32)
    h = jnp.maximum(h + b1_ref[...], 0.0)                          # (1, Cr)
    g = jnp.dot(h, w2_ref[...], preferred_element_type=jnp.float32)
    g = jax.nn.sigmoid(g + b2_ref[...])                            # (1, C)
    gate = g.astype(o_ref.dtype)[:, :, None]                       # (1, C, 1)
    o_ref[...] = x * gate                                          # lane bcast


# --------------------------------------------------------------------------
# Fallback phase 1: accumulate spatial sums across HW tiles; on the last tile
# run the excitation MLP exactly once per batch element.
# --------------------------------------------------------------------------
def _pool_gate_kernel(x_ref, w1_ref, b1_ref, w2_ref, b2_ref, y_ref, acc_ref,
                      *, inv_hw):
    t = pl.program_id(1)

    @pl.when(t == 0)
    def _init():
        acc_ref[...] = jnp.zeros_like(acc_ref)

    acc_ref[...] += jnp.sum(x_ref[...].astype(jnp.float32), axis=-1)

    @pl.when(t == pl.num_programs(1) - 1)
    def _finalize():
        pooled = acc_ref[...] * inv_hw                             # (1, C)
        h = jnp.dot(pooled, w1_ref[...],
                    preferred_element_type=jnp.float32)            # (1, Cr)
        h = jnp.maximum(h + b1_ref[...], 0.0)
        g = jnp.dot(h, w2_ref[...],
                    preferred_element_type=jnp.float32)            # (1, C)
        g = jax.nn.sigmoid(g + b2_ref[...])
        y_ref[...] = g.reshape(y_ref.shape).astype(y_ref.dtype)    # (1, 1, C)


# --------------------------------------------------------------------------
# Fallback phase 2: mem-bound elementwise scale, gate broadcast over lanes.
# --------------------------------------------------------------------------
def _scale_kernel(x_ref, g_ref, o_ref):
    o_ref[...] = (x_ref[...] * g_ref[...]).astype(o_ref.dtype)


def _pick_hw_tile(C, HW, itemsize, target_bytes=_TARGET_BLOCK_BYTES):
    """Largest spatial tile that is a multiple of 128, divides HW, and keeps
    the (C, tile) slab under the per-block budget.  Falls back to the full
    spatial extent when HW is not a multiple of 128 (block dim must then equal
    the full array dim)."""
    if C * HW * itemsize <= target_bytes or HW % 128 != 0:
        # TODO(synk): huge inputs whose H*W is not a multiple of 128 would need
        # masked partial-tile accumulation; not required at these shapes.
        return HW
    max_tile = max(128, (target_bytes // (C * itemsize)) // 128 * 128)
    tile = max(128, min(max_tile, HW) // 128 * 128)
    while tile > 128 and HW % tile != 0:
        tile -= 128
    return tile if HW % tile == 0 else HW


@jax.jit
def se_block(x, w1, b1, w2, b2):
    """x: (B, C, H, W).  w1: (C, Cr), b1: (Cr,), w2: (Cr, C), b2: (C,).

    Weights are stored (in, out), i.e. transposed relative to torch.nn.Linear's
    (out, in) layout, so the kernels do plain row-major matmuls.
    """
    B, C, H, W = x.shape
    Cr = w1.shape[1]
    HW = H * W

    x_flat = x.reshape(B, C, HW)
    b1_2d = b1.reshape(1, Cr)
    b2_2d = b2.reshape(1, C)

    tile_bytes = C * HW * x.dtype.itemsize

    # ---- Fused single-pass path (read x once, write once) -------------------
    if tile_bytes <= _FUSED_TILE_BYTES:
        out_flat = pl.pallas_call(
            functools.partial(_fused_se_kernel, inv_hw=1.0 / HW),
            out_shape=jax.ShapeDtypeStruct((B, C, HW), x.dtype),
            grid=(B,),
            in_specs=[
                pl.BlockSpec((1, C, HW), lambda b: (b, 0, 0)),
                pl.BlockSpec((C, Cr), lambda b: (0, 0)),
                pl.BlockSpec((1, Cr), lambda b: (0, 0)),
                pl.BlockSpec((Cr, C), lambda b: (0, 0)),
                pl.BlockSpec((1, C), lambda b: (0, 0)),
            ],
            out_specs=pl.BlockSpec((1, C, HW), lambda b: (b, 0, 0)),
            input_output_aliases={0: 0},
            compiler_params=pltpu.CompilerParams(
                dimension_semantics=("parallel",),
                vmem_limit_bytes=_VMEM_LIMIT_BYTES,
            ),
        )(x_flat, w1, b1_2d, w2, b2_2d)
        return out_flat.reshape(B, C, H, W)

    # ---- Two-phase fallback for slabs too large to hold in VMEM -------------
    hw_tile = _pick_hw_tile(C, HW, x.dtype.itemsize)
    n_t = HW // hw_tile

    gate = pl.pallas_call(
        functools.partial(_pool_gate_kernel, inv_hw=1.0 / HW),
        out_shape=jax.ShapeDtypeStruct((B, 1, C), jnp.float32),
        grid=(B, n_t),
        in_specs=[
            pl.BlockSpec((1, C, hw_tile), lambda b, t: (b, 0, t)),
            pl.BlockSpec((C, Cr), lambda b, t: (0, 0)),
            pl.BlockSpec((1, Cr), lambda b, t: (0, 0)),
            pl.BlockSpec((Cr, C), lambda b, t: (0, 0)),
            pl.BlockSpec((1, C), lambda b, t: (0, 0)),
        ],
        out_specs=pl.BlockSpec((1, 1, C), lambda b, t: (b, 0, 0)),
        scratch_shapes=[pltpu.VMEM((1, C), jnp.float32)],
        compiler_params=pltpu.CompilerParams(
            dimension_semantics=("parallel", "arbitrary"),
            vmem_limit_bytes=_VMEM_LIMIT_BYTES,
        ),
    )(x_flat, w1, b1_2d, w2, b2_2d)

    # Tiny (B, C) transpose in XLA so the gate arrives with C on the sublane
    # axis, ready to broadcast over the spatial lane axis inside the kernel.
    gate_col = jnp.swapaxes(gate, 1, 2).astype(x.dtype)            # (B, C, 1)

    out_flat = pl.pallas_call(
        _scale_kernel,
        out_shape=jax.ShapeDtypeStruct((B, C, HW), x.dtype),
        grid=(B, n_t),
        in_specs=[
            pl.BlockSpec((1, C, hw_tile), lambda b, t: (b, 0, t)),
            pl.BlockSpec((1, C, 1), lambda b, t: (b, 0, 0)),
        ],
        out_specs=pl.BlockSpec((1, C, hw_tile), lambda b, t: (b, 0, t)),
        input_output_aliases={0: 0},
        compiler_params=pltpu.CompilerParams(
            dimension_semantics=("parallel", "parallel"),
            vmem_limit_bytes=_VMEM_LIMIT_BYTES,
        ),
    )(x_flat, gate_col)

    return out_flat.reshape(B, C, H, W)


def _reference(x, w1, b1, w2, b2):
    pooled = jnp.mean(x, axis=(2, 3))                              # (B, C)
    h = jnp.maximum(pooled @ w1 + b1, 0.0)                         # (B, Cr)
    y = jax.nn.sigmoid(h @ w2 + b2)                                # (B, C)
    return x * y[:, :, None, None]


if __name__ == "__main__":
    # SEBlock(channels=4, reduction=1) on an input of shape (2, 4, 16, 16)
    B, C, H, W = 2, 4, 16, 16
    reduction = 1
    Cr = C // reduction

    key = jax.random.PRNGKey(0)
    kx, k1, k2, k3, k4 = jax.random.split(key, 5)

    x = jax.random.normal(kx, (B, C, H, W), dtype=jnp.float32)

    # Deterministic synthetic parameters (shapes match nn.Linear(C, Cr) and
    # nn.Linear(Cr, C)); stored as (in, out) for the kernels' matmuls.
    bound1 = 1.0 / (C ** 0.5)
    bound2 = 1.0 / (Cr ** 0.5)
    w1 = jax.random.uniform(k1, (C, Cr), jnp.float32, -bound1, bound1)
    b1 = jax.random.uniform(k2, (Cr,), jnp.float32, -bound1, bound1)
    w2 = jax.random.uniform(k3, (Cr, C), jnp.float32, -bound2, bound2)
    b2 = jax.random.uniform(k4, (C,), jnp.float32, -bound2, bound2)

    out = se_block(x, w1, b1, w2, b2)
    out = jax.block_until_ready(out)

    ref = _reference(x, w1, b1, w2, b2)
    assert out.shape == (B, C, H, W)
    assert jnp.allclose(out, ref, atol=1e-5, rtol=1e-5), "mismatch vs reference"

    print("KERNEL_OK")
</pallas_src>

<mosaic_0001>
module attributes {stable_mosaic.version = 11 : i64} {
  func.func @_fused_se_kernel(%arg0: i32, %arg1: memref<1x4x256xf32, #tpu.memory_space<vmem>>, %arg2: memref<4x4xf32, #tpu.memory_space<vmem>>, %arg3: memref<1x4xf32, #tpu.memory_space<vmem>>, %arg4: memref<4x4xf32, #tpu.memory_space<vmem>>, %arg5: memref<1x4xf32, #tpu.memory_space<vmem>>, %arg6: memref<1x4x256xf32, #tpu.memory_space<vmem>>) attributes {dimension_semantics = [#tpu.dimension_semantics<parallel>], iteration_bounds = array<i64: 2>, scalar_prefetch = 0 : i64, scratch_operands = 0 : i64, tpu.core_type = #tpu.core_type<tc>, window_params = [{transform_indices = @transform_0, window_bounds = array<i64: 1, 4, 256>}, {pipeline_mode = #tpu.pipeline_mode<synchronous>, transform_indices = @transform_1, window_bounds = array<i64: 4, 4>}, {pipeline_mode = #tpu.pipeline_mode<synchronous>, transform_indices = @transform_2, window_bounds = array<i64: 1, 4>}, {pipeline_mode = #tpu.pipeline_mode<synchronous>, transform_indices = @transform_3, window_bounds = array<i64: 4, 4>}, {pipeline_mode = #tpu.pipeline_mode<synchronous>, transform_indices = @transform_4, window_bounds = array<i64: 1, 4>}, {transform_indices = @transform_5, window_bounds = array<i64: 1, 4, 256>}]} {
    %c0 = arith.constant 0 : index
    %c0_0 = arith.constant 0 : index
    %c0_1 = arith.constant 0 : index
    %0 = vector.load %arg1[%c0, %c0_0, %c0_1] : memref<1x4x256xf32, #tpu.memory_space<vmem>>, vector<1x4x256xf32>
    %cst = arith.constant dense<0.000000e+00> : vector<1x4xf32>
    %1 = vector.multi_reduction <add>, %0, %cst [2] : vector<1x4x256xf32> to vector<1x4xf32>
    %cst_2 = arith.constant 3.906250e-03 : f32
    %2 = vector.broadcast %cst_2 : f32 to vector<1x4xf32>
    %3 = arith.mulf %1, %2 : vector<1x4xf32>
    %c0_3 = arith.constant 0 : index
    %c0_4 = arith.constant 0 : index
    %4 = vector.load %arg2[%c0_3, %c0_4] : memref<4x4xf32, #tpu.memory_space<vmem>>, vector<4x4xf32>
    %cst_5 = arith.constant dense<0.000000e+00> : vector<1x4xf32>
    %5 = tpu.matmul %3, %4, %cst_5 {dimension_numbers = #tpu.dot_dimension_numbers<[1], [0], [0], [1], [0, 0, 1, 1], [], []>} : vector<1x4xf32>, vector<4x4xf32>, vector<1x4xf32> -> vector<1x4xf32>
    %c0_6 = arith.constant 0 : index
    %c0_7 = arith.constant 0 : index
    %6 = vector.load %arg3[%c0_6, %c0_7] : memref<1x4xf32, #tpu.memory_space<vmem>>, vector<1x4xf32>
    %7 = arith.addf %5, %6 : vector<1x4xf32>
    %cst_8 = arith.constant 0.000000e+00 : f32
    %8 = vector.broadcast %cst_8 : f32 to vector<1x4xf32>
    %9 = arith.maximumf %7, %8 : vector<1x4xf32>
    %c0_9 = arith.constant 0 : index
    %c0_10 = arith.constant 0 : index
    %10 = vector.load %arg4[%c0_9, %c0_10] : memref<4x4xf32, #tpu.memory_space<vmem>>, vector<4x4xf32>
    %cst_11 = arith.constant dense<0.000000e+00> : vector<1x4xf32>
    %11 = tpu.matmul %9, %10, %cst_11 {dimension_numbers = #tpu.dot_dimension_numbers<[1], [0], [0], [1], [0, 0, 1, 1], [], []>} : vector<1x4xf32>, vector<4x4xf32>, vector<1x4xf32> -> vector<1x4xf32>
    %c0_12 = arith.constant 0 : index
    %c0_13 = arith.constant 0 : index
    %12 = vector.load %arg5[%c0_12, %c0_13] : memref<1x4xf32, #tpu.memory_space<vmem>>, vector<1x4xf32>
    %13 = arith.addf %11, %12 : vector<1x4xf32>
    %14 = arith.negf %13 : vector<1x4xf32>
    %15 = math.exp %14 : vector<1x4xf32>
    %cst_14 = arith.constant 1.000000e+00 : f32
    %16 = vector.broadcast %cst_14 : f32 to vector<1x4xf32>
    %17 = arith.addf %16, %15 : vector<1x4xf32>
    %18 = arith.divf %16, %17 : vector<1x4xf32>
    %19 = vector.shape_cast %18 : vector<1x4xf32> to vector<1x4x1xf32>
    %20 = vector.broadcast %19 : vector<1x4x1xf32> to vector<1x4x256xf32>
    %21 = arith.mulf %0, %20 : vector<1x4x256xf32>
    %c0_15 = arith.constant 0 : index
    %c0_16 = arith.constant 0 : index
    %c0_17 = arith.constant 0 : index
    %22 = vector.load %arg6[%c0_15, %c0_16, %c0_17] : memref<1x4x256xf32, #tpu.memory_space<vmem>>, vector<1x4x256xf32>
    tpu.vector_store %arg6[%c0_15, %c0_16, %c0_17], %21 {strides = array<i32>} : memref<1x4x256xf32, #tpu.memory_space<vmem>>, vector<1x4x256xf32>,
    return
  }
  func.func @transform_0(%arg0: i32) -> (i32, i32, i32) {
    %c0_i32 = arith.constant 0 : i32
    %c0_i32_0 = arith.constant 0 : i32
    %c0_i32_1 = arith.constant 0 : i32
    return %arg0, %c0_i32, %c0_i32_0 : i32, i32, i32
  }
  func.func @transform_1(%arg0: i32) -> (i32, i32) {
    %c0_i32 = arith.constant 0 : i32
    %c0_i32_0 = arith.constant 0 : i32
    %c0_i32_1 = arith.constant 0 : i32
    return %c0_i32, %c0_i32_0 : i32, i32
  }
  func.func @transform_2(%arg0: i32) -> (i32, i32) {
    %c0_i32 = arith.constant 0 : i32
    %c0_i32_0 = arith.constant 0 : i32
    %c0_i32_1 = arith.constant 0 : i32
    return %c0_i32, %c0_i32_0 : i32, i32
  }
  func.func @transform_3(%arg0: i32) -> (i32, i32) {
    %c0_i32 = arith.constant 0 : i32
    %c0_i32_0 = arith.constant 0 : i32
    %c0_i32_1 = arith.constant 0 : i32
    return %c0_i32, %c0_i32_0 : i32, i32
  }
  func.func @transform_4(%arg0: i32) -> (i32, i32) {
    %c0_i32 = arith.constant 0 : i32
    %c0_i32_0 = arith.constant 0 : i32
    %c0_i32_1 = arith.constant 0 : i32
    return %c0_i32, %c0_i32_0 : i32, i32
  }
  func.func @transform_5(%arg0: i32) -> (i32, i32, i32) {
    %c0_i32 = arith.constant 0 : i32
    %c0_i32_0 = arith.constant 0 : i32
    %c0_i32_1 = arith.constant 0 : i32
    return %arg0, %c0_i32, %c0_i32_0 : i32, i32, i32
  }
}

</mosaic_0001>

<bundles_post_ra>
// kernel: se_block.1
= control target key start
LH: loop header
LB: loop body
LE: loop exit
PB: predicated region body
PF: predicated region fallthrough
CT: control target
= control target key end

     0   :  { %s460_s18 = smov 0   ;;  %s500_s0 = inlined_call_operand.vmem [shape: f32[2,4,256], index: 0, kind: input, shape index: {}, may-alias: {0,5}]   ;;  %s501_s1 = inlined_call_operand.vmem [shape: f32[4,4], index: 1, kind: input, shape index: {}]   ;;  %s502_s2 = inlined_call_operand.vmem [shape: f32[1,4], index: 2, kind: input, shape index: {}]   ;;  %s503_s3 = inlined_call_operand.vmem [shape: f32[4,4], index: 3, kind: input, shape index: {}]   ;;  %s504_s4 = inlined_call_operand.vmem [shape: f32[1,4], index: 4, kind: input, shape index: {}]   ;;  %s505_s5 = inlined_call_operand.vmem [shape: f32[2,4,256], index: 5, kind: output, shape index: {}, may-alias: {0,5}]  }
   0x1 LB: > { %s389_s19 = sadd.s32 4294967295, %s427_s18   ;;  %p393_p0 = scmp.ge.s32.totalorder %s427_s18, 1  ;;  %s427_s18 = sphi %s460_s18, %s15_s18  }
   0x2   : > { %p187_p1 = scmp.lt.s32.totalorder %s427_s18, 3 }
   0x4   : > { %p188_p2 = pnand %p393_p0, %p187_p1 }
   0x5   : > { %p215_p3 = scmp.lt.s32.totalorder (!%p188_p2), %s389_s19, 1 }
   0x6   : > { %191 = sbr.rel (%p188_p2) target bundleno = 554 (0x22a), region = 40 }
   0xb   : > { %s507_s19 = smov (!%p215_p3, %s389_s19), 1  ;;  %vm232_vm0 = vcmask 1043456   ;;  %v239_v6 = vld [vmem:[%s501_s1] sm:$0xf]  ;;  %v242_v7 = vlaneseq  ;;  %vm245_vm1 = vcmask 31744  }
   0xc   : > { %s405_s20 = sshll.u32 %s507_s19, 3  ;;  %398 = vmatpush.msk.msra.mxu0 %vm232_vm0, %v239_v6  ;;  %v272_v12 = vld [vmem:[%s503_s3] sm:$0xf]  ;;  %v429_v35 = vmov 839922192  }
   0xd   : > { %s219_s23 = scalar_lea.vmem %s500_s0, %s405_s20  ;;  %v243_v8 = vand.u32 127, %v242_v7  ;;  %400 = vmatpush.msk.msra.mxu1 %vm232_vm0, %v272_v12  ;;  %v240_v13 = vld [vmem:[%s502_s2] sm:$0x1]  ;;  %v321_v17 = vshrl.u32 %v242_v7, 7  ;;  %v328_v36 = vunpack.c.l.s4 %v429_v35  ;;  %s224_s9 = scalar_lea.vmem %s505_s5, %s405_s20 }
   0xe   : > { %v225_v0 = vld [vmem:[%s219_s23] sm:$0xff] }
   0xf   : > { %227 = vst [vmem:[#allocation1] ss:$2 sm:$0xff] %v225_v0  ;;  %416 = vset.pattern.permute.xlu0 %v321_v17  ;;  %v273_v18 = vld [vmem:[%s504_s4] sm:$0x1]  ;;  %v329_v37 = vunpack.c.0.s8 %v328_v36 }
  0x16   : > { %v228_v1 = vld.sshfl [vmem:[#allocation1] sm:$0xff pattern:$0x75316420]  ;;  %v229_v2 = vld.sshfl [vmem:[#allocation1 + $0x8] sm:$0xff pattern:$0x75316420] }
  0x17   : > { %v233_v3 = vsel %vm232_vm0, %v228_v1, 0.0  ;;  %v234_v4 = vsel %vm232_vm0, %v229_v2, 0.0 }
  0x18   : > { %v235_v5 = vadd.f32 %v234_v4, %v233_v3 }
  0x1a   : > { %236 = vadd.xlane.f32.xlu0 %v235_v5 }
  0x8d   : > { %v237_v9 = vpop.xlane.xlu0 %236 }
  0x8e   : > { %v238_v10 = vmul.f32 0.00390625, %v237_v9 }
  0x90   : > { %v244_v11 = vperm.slane %v238_v10, %v243_v8 }
  0x92   : > { %399 = vmatmul.msk.f32.vlgmr.msra.gmra.mxu0 %vm245_vm1, %v244_v11 }
 0x10f   : > { %v268_v14 = vpop.f32.mrf.mxu0 }
 0x110   : > { %v269_v15 = vadd.f32 %v268_v14, %v240_v13 }
 0x112   : > { %v271_v16 = vmax.f32 %v269_v15, 0.0 }
 0x114   : > { %401 = vmatmul.msk.f32.vlgmr.msra.gmra.mxu1 %vm245_vm1, %v271_v16 }
 0x191   : > { %v297_v19 = vpop.f32.mrf.mxu1 }
 0x192   : > { %v298_v20 = vadd.f32 %v297_v19, %v273_v18 }
 0x194   : > { %v402_v21 = vmul.f32 -1.442695, %v298_v20 }
 0x196   : > { %417 = vpow2.f32 %v402_v21 }
 0x19c   : > { %v418_v22 = vpop.eup %417 }
 0x19d   : > { %v303_v23 = vadd.f32 1.0, %v418_v22 }
 0x19f   : > { %419 = vrcp.f32 %v303_v23  ;;  %v315_v27 = vand.u32 2147483648, %v303_v23  ;;  %v313_v29 = vand.u32 2147483647, %v303_v23  ;;  %vm309_vm3 = vweird.f32 %v303_v23 }
 0x1a1   : > { %v316_v31 = vor.u32 1.1754944e-38, %v315_v27  ;;  %vm314_vm5 = vcmp.eq.f32.partialorder %v313_v29, 8.507059e+37 }
 0x1a5   : > { %v420_v24 = vpop.eup %419 }
 0x1a6   : > { %v305_v25 = vmul.f32 %v420_v24, %v303_v23  ;;  %vm310_vm2 = vweird.f32 %v420_v24 }
 0x1a7   : > { %vm311_vm4 = vmor %vm309_vm3, %vm310_vm2 }
 0x1a8   : > { %v306_v26 = vsub.f32 1.0, %v305_v25 }
 0x1aa   : > { %v307_v28 = vmul.f32 %v420_v24, %v306_v26 }
 0x1ac   : > { %v308_v30 = vadd.f32 %v420_v24, %v307_v28 }
 0x1ae   : > { %v312_v32 = vsel %vm311_vm4, %v420_v24, %v308_v30 }
 0x1af   : > { %v317_v33 = vsel %vm314_vm5, %v316_v31, %v312_v32 }
 0x1b0   : > { %v319_v34 = vperm.slane %v317_v33, 0 }
 0x1b2   : > { %324 = vperm.xlu0 %416, %v319_v34  }
 0x224   : > { %v325_v38 = vpop.permute.xlu0 %324 }
 0x225   : > { %v330_v39 = vperm.slane %v325_v38, %v329_v37 }
 0x227   : > { %v332_v40 = vmul.f32 %v330_v39, %v225_v0 }
 0x229   : > { %333 = vst [vmem:[%s224_s9] sm:$0xff] %v332_v40 }
 0x22a PF: > { %s15_s18 = sadd.s32 1, %s427_s18  }
 0x22b   : > { %p12_p4 = scmp.ge.s32.totalorder %s15_s18, 4  }
 0x22d   :  { %14 = sbr.rel (!%p12_p4) target bundleno = 1 (0x1), region = 70 }

</bundles_post_ra>
